<compile_context>
chip_gen: v7x
topology: tpu7x:2x2x1
jax: 0.10.0
libtpu: 0.0.40
codegen_flags: <defaults>
</compile_context>

<pallas_src>
import functools

import jax
import jax.numpy as jnp
from jax.experimental import pallas as pl
from jax.experimental.pallas import tpu as pltpu


def _round_up(a: int, b: int) -> int:
    return (a + b - 1) // b * b


def _tv_kernel(x_ref, out_ref, *, w):
    """One grid step: a (P, H*W) slab of image planes -> two partial sums.

    Layout: element (p, j) of the slab is x[plane p, h = j // w, w_idx = j % w],
    so both TV differences are shifts along the lane axis:
      * W-direction:  x[p,h,wi] - x[p,h,wi-1]  -> lane roll by 1,  mask j % w == 0
      * H-direction:  x[p,h,wi] - x[p,h-1,wi]  -> lane roll by w,  mask j < w
    The roll wraps circularly, but the wrapped positions are exactly the masked ones.
    """
    x = x_ref[...].astype(jnp.float32)                       # (P, H*W), f32 accumulation
    lane = jax.lax.broadcasted_iota(jnp.int32, x.shape, 1)   # index j along H*W

    # W-direction squared differences (lane-dense, no unaligned slices).
    dw = x - pltpu.roll(x, shift=1, axis=1)
    dw = jnp.where(lane % w != 0, dw, 0.0)

    # H-direction squared differences.
    dh = x - pltpu.roll(x, shift=w, axis=1)
    dh = jnp.where(lane >= w, dh, 0.0)

    h_sum = jnp.sum(dh * dh)
    w_sum = jnp.sum(dw * dw)

    # Per-block partial sums written to this step's own (8,128)-aligned output
    # tile (broadcast scalar -> vreg); the final combine happens outside.
    out_ref[0, 0] = jnp.full((8, 128), h_sum, dtype=jnp.float32)
    out_ref[0, 1] = jnp.full((8, 128), w_sum, dtype=jnp.float32)


def tv_loss(x, tv_loss_weight=1.0):
    """x: (N, C, H, W). Returns scalar f32 TV loss (matches PyTorch TVLoss)."""
    n, c, h, w = x.shape
    count_h = float(c * (h - 1) * w)
    count_w = float(c * h * (w - 1))

    planes = n * c
    hw = h * w
    x2d = x.reshape(planes, hw)  # free reshape; keep native dtype for the DMA

    itemsize = jnp.dtype(x.dtype).itemsize
    sub = {4: 8, 2: 16, 1: 32}.get(itemsize, 8)  # sublane tile for this dtype

    # ~2 MiB input blocks: large enough to amortize per-step overhead, small
    # enough that double-buffering fits scoped VMEM on v5e/v6e/v7x.
    target_elems = (2 * 1024 * 1024) // itemsize
    p_blk = max(sub, (max(1, target_elems // hw) // sub) * sub)
    num_blocks = pl.cdiv(planes, p_blk)
    # Re-balance the block size so zero-padding along the plane axis stays small.
    p_blk = _round_up(pl.cdiv(planes, num_blocks), sub)
    padded_planes = num_blocks * p_blk
    if padded_planes != planes:
        # Zero planes contribute exactly 0 to both TV sums.
        x2d = jnp.pad(x2d, ((0, padded_planes - planes), (0, 0)))

    kernel = functools.partial(_tv_kernel, w=w)

    partials = pl.pallas_call(
        kernel,
        out_shape=jax.ShapeDtypeStruct((num_blocks, 2, 8, 128), jnp.float32),
        grid_spec=pltpu.PrefetchScalarGridSpec(
            num_scalar_prefetch=0,
            grid=(num_blocks,),
            in_specs=[pl.BlockSpec((p_blk, hw), lambda i: (i, 0))],
            out_specs=pl.BlockSpec((1, 2, 8, 128), lambda i: (i, 0, 0, 0)),
        ),
        compiler_params=pltpu.CompilerParams(
            # Independent blocks + disjoint output tiles -> shards across both
            # TensorCores on v7x; no-op on v5e/v6e.
            dimension_semantics=("parallel",),
            vmem_limit_bytes=32 * 1024 * 1024,
        ),
    )(x2d)

    # Tiny final combine + normalization in plain JAX.
    h_tv = jnp.sum(partials[:, 0, 0, 0])
    w_tv = jnp.sum(partials[:, 1, 0, 0])
    return tv_loss_weight * 2.0 * (h_tv / count_h + w_tv / count_w) / float(n)


def tv_loss_ref(x, tv_loss_weight=1.0):
    """Pure-JAX reference mirroring the PyTorch forward."""
    n, c, h, w = x.shape
    count_h = c * (h - 1) * w
    count_w = c * h * (w - 1)
    xf = x.astype(jnp.float32)
    h_tv = jnp.sum((xf[:, :, 1:, :] - xf[:, :, : h - 1, :]) ** 2)
    w_tv = jnp.sum((xf[:, :, :, 1:] - xf[:, :, :, : w - 1]) ** 2)
    return tv_loss_weight * 2.0 * (h_tv / count_h + w_tv / count_w) / n


if __name__ == "__main__":
    key = jax.random.PRNGKey(0)
    x = jax.random.normal(key, (2, 4, 16, 16), dtype=jnp.float32)

    out = tv_loss(x, tv_loss_weight=1.0)
    out = jax.block_until_ready(out)

    ref = tv_loss_ref(x, tv_loss_weight=1.0)
    assert jnp.allclose(out, ref, rtol=1e-5, atol=1e-5), (out, ref)

    print("KERNEL_OK")
</pallas_src>

<mosaic_0001>
module attributes {stable_mosaic.version = 11 : i64} {
  func.func @_tv_kernel(%arg0: i32, %arg1: memref<8x256xf32, #tpu.memory_space<vmem>>, %arg2: memref<1x2x8x128xf32, #tpu.memory_space<vmem>>) attributes {dimension_semantics = [#tpu.dimension_semantics<parallel>], iteration_bounds = array<i64: 1>, scalar_prefetch = 0 : i64, scratch_operands = 0 : i64, tpu.core_type = #tpu.core_type<tc>, window_params = [{transform_indices = @transform_0, window_bounds = array<i64: 8, 256>}, {transform_indices = @transform_1, window_bounds = array<i64: 1, 2, 8, 128>}]} {
    %c0 = arith.constant 0 : index
    %c0_0 = arith.constant 0 : index
    %0 = vector.load %arg1[%c0, %c0_0] : memref<8x256xf32, #tpu.memory_space<vmem>>, vector<8x256xf32>
    %1 = tpu.iota {dimensions = array<i32: 1>} : vector<8x256xi32>
    %c1_i32 = arith.constant 1 : i32
    %2 = tpu.dynamic_rotate %0 by %c1_i32 dim 1 : vector<8x256xf32>, i32 -> vector<8x256xf32>
    %3 = arith.subf %0, %2 : vector<8x256xf32>
    %c16_i32 = arith.constant 16 : i32
    %c0_i32 = arith.constant 0 : i32
    %4 = arith.cmpi eq, %c16_i32, %c0_i32 : i32
    %c1_i32_1 = arith.constant 1 : i32
    %5 = arith.select %4, %c1_i32_1, %c16_i32 : i32
    %6 = vector.broadcast %5 : i32 to vector<8x256xi32>
    %7 = arith.remsi %1, %6 : vector<8x256xi32>
    %c0_i32_2 = arith.constant 0 : i32
    %8 = vector.broadcast %c0_i32_2 : i32 to vector<8x256xi32>
    %9 = arith.cmpi ne, %7, %8 : vector<8x256xi32>
    %c0_i32_3 = arith.constant 0 : i32
    %10 = vector.broadcast %c0_i32_3 : i32 to vector<8x256xi32>
    %11 = arith.cmpi slt, %7, %10 : vector<8x256xi32>
    %c0_i32_4 = arith.constant 0 : i32
    %12 = arith.cmpi slt, %5, %c0_i32_4 : i32
    %13 = vector.broadcast %12 : i1 to vector<8x256xi1>
    %14 = vector.broadcast %13 : vector<8x256xi1> to vector<8x256xi1>
    %15 = arith.xori %11, %14 : vector<8x256xi1>
    %16 = arith.andi %15, %9 : vector<8x256xi1>
    %17 = vector.broadcast %5 : i32 to vector<8x256xi32>
    %18 = arith.addi %7, %17 : vector<8x256xi32>
    %19 = arith.select %16, %18, %7 : vector<8x256xi1>, vector<8x256xi32>
    %c0_i32_5 = arith.constant 0 : i32
    %20 = vector.broadcast %c0_i32_5 : i32 to vector<8x256xi32>
    %21 = arith.cmpi ne, %19, %20 : vector<8x256xi32>
    %cst = arith.constant 0.000000e+00 : f32
    %22 = vector.broadcast %cst : f32 to vector<8x256xf32>
    %23 = arith.select %21, %3, %22 : vector<8x256xi1>, vector<8x256xf32>
    %c16_i32_6 = arith.constant 16 : i32
    %24 = tpu.dynamic_rotate %0 by %c16_i32_6 dim 1 : vector<8x256xf32>, i32 -> vector<8x256xf32>
    %25 = arith.subf %0, %24 : vector<8x256xf32>
    %c16_i32_7 = arith.constant 16 : i32
    %26 = vector.broadcast %c16_i32_7 : i32 to vector<8x256xi32>
    %27 = arith.cmpi sge, %1, %26 : vector<8x256xi32>
    %cst_8 = arith.constant 0.000000e+00 : f32
    %28 = vector.broadcast %cst_8 : f32 to vector<8x256xf32>
    %29 = arith.select %27, %25, %28 : vector<8x256xi1>, vector<8x256xf32>
    %30 = arith.mulf %29, %29 : vector<8x256xf32>
    %31 = vector.shape_cast %30 : vector<8x256xf32> to vector<1x8x256xf32>
    %cst_9 = arith.constant dense<0.000000e+00> : vector<1xf32>
    %32 = vector.multi_reduction <add>, %31, %cst_9 [1, 2] : vector<1x8x256xf32> to vector<1xf32>
    %33 = vector.shape_cast %32 : vector<1xf32> to vector<1x1x1xf32>
    %34 = vector.extract %33[0, 0, 0] : f32 from vector<1x1x1xf32>
    %35 = arith.mulf %23, %23 : vector<8x256xf32>
    %36 = vector.shape_cast %35 : vector<8x256xf32> to vector<1x8x256xf32>
    %cst_10 = arith.constant dense<0.000000e+00> : vector<1xf32>
    %37 = vector.multi_reduction <add>, %36, %cst_10 [1, 2] : vector<1x8x256xf32> to vector<1xf32>
    %38 = vector.shape_cast %37 : vector<1xf32> to vector<1x1x1xf32>
    %39 = vector.extract %38[0, 0, 0] : f32 from vector<1x1x1xf32>
    %40 = vector.broadcast %34 : f32 to vector<8x128xf32>
    %c0_11 = arith.constant 0 : index
    %c0_12 = arith.constant 0 : index
    %c0_13 = arith.constant 0 : index
    %c0_14 = arith.constant 0 : index
    %41 = vector.load %arg2[%c0_11, %c0_12, %c0_13, %c0_14] : memref<1x2x8x128xf32, #tpu.memory_space<vmem>>, vector<1x1x8x128xf32>
    %42 = vector.shape_cast %41 : vector<1x1x8x128xf32> to vector<8x128xf32>
    %43 = vector.shape_cast %40 : vector<8x128xf32> to vector<1x1x8x128xf32>
    tpu.vector_store %arg2[%c0_11, %c0_12, %c0_13, %c0_14], %43 {strides = array<i32>} : memref<1x2x8x128xf32, #tpu.memory_space<vmem>>, vector<1x1x8x128xf32>,
    %44 = vector.broadcast %39 : f32 to vector<8x128xf32>
    %c0_15 = arith.constant 0 : index
    %c1 = arith.constant 1 : index
    %c0_16 = arith.constant 0 : index
    %c0_17 = arith.constant 0 : index
    %45 = vector.load %arg2[%c0_15, %c1, %c0_16, %c0_17] : memref<1x2x8x128xf32, #tpu.memory_space<vmem>>, vector<1x1x8x128xf32>
    %46 = vector.shape_cast %45 : vector<1x1x8x128xf32> to vector<8x128xf32>
    %47 = vector.shape_cast %44 : vector<8x128xf32> to vector<1x1x8x128xf32>
    tpu.vector_store %arg2[%c0_15, %c1, %c0_16, %c0_17], %47 {strides = array<i32>} : memref<1x2x8x128xf32, #tpu.memory_space<vmem>>, vector<1x1x8x128xf32>,
    return
  }
  func.func @transform_0(%arg0: i32) -> (i32, i32) {
    %c0_i32 = arith.constant 0 : i32
    %c0_i32_0 = arith.constant 0 : i32
    return %arg0, %c0_i32 : i32, i32
  }
  func.func @transform_1(%arg0: i32) -> (i32, i32, i32, i32) {
    %c0_i32 = arith.constant 0 : i32
    %c0_i32_0 = arith.constant 0 : i32
    %c0_i32_1 = arith.constant 0 : i32
    %c0_i32_2 = arith.constant 0 : i32
    return %arg0, %c0_i32, %c0_i32_0, %c0_i32_1 : i32, i32, i32, i32
  }
}

</mosaic_0001>

<bundles_post_ra>
// kernel: tpu_custom_call.1
= control target key start
LH: loop header
LB: loop body
LE: loop exit
PB: predicated region body
PF: predicated region fallthrough
CT: control target
= control target key end

     0   :  { %6 = vsyncpa [#allocation3], 0  ;;  %s220_s0 = inlined_call_operand.hbm [shape: f32[8,256], index: 0, kind: input, shape index: {}]   ;;  %s221_s1 = inlined_call_operand.hbm [shape: f32[1,2,8,128], index: 1, kind: output, shape index: {}]  }
   0x1   :  { %7 = vsyncpa [#allocation4], 0  ;;  %s180_s6 = smov [#allocation2]   ;;  %s132_s10 = scalar_lea.hbm %s220_s0, 256 }
   0x2   :  { %s14_s7 = sshll.u32 %s180_s6, 4  ;;  %p133_p0 = scmp.ne.s32.totalorder %s220_s0, %s132_s10  ;;  %s15_s7 = int_to_ptr.vmem [resolvable:$true] %s14_s7 }
   0x3   :  { %p136_p1 = scmp.lt.u32.totalorder %s132_s10, %s220_s0 }
   0x5   :  { %p138_p2 = pnand %p136_p1, %p133_p0 }
   0x7   :  { %141 = shalt.err (!%p138_p2)
}
   0x8   :  { %s142_s15 = scalar_lea.vmem %s15_s7, 256  ;;  %p147_p4 = scmp.lt.s32.totalorder %s15_s7, %s15_s7 }
   0x9   :  { %p143_p3 = scmp.ne.s32.totalorder %s15_s7, %s142_s15  ;;  %p148_p5 = scmp.lt.s32.totalorder %s142_s15, %s142_s15 }
   0xb   :  { %p149_p6 = por %p148_p5, %p147_p4 }
   0xd   :  { %p150_p7 = pnand %p149_p6, %p143_p3 }
   0xf   :  { %153 = shalt.err (!%p150_p7)
}
  0x10   :  { %17 = dma.hbm_to_vmem [thread:$0]  %s220_s0, 256, %s15_s7, [#allocation3]  }
  0x11   :  { %176 = dma.done.wait [#allocation3], 256  }
  0x12   :  { %177 = vsyncadd [#allocation3], 4294967040  ;;  %v21_v0 = vld [vmem:[#allocation2] sm:$0xff]  ;;  %s181_s18 = smov 16   ;;  %s182_s19 = smov 1   ;;  %v22_v1 = vld [vmem:[#allocation2 + $0x8] sm:$0xff]  ;;  %v23_v2 = vlaneseq }
  0x13   :  { %63 = vrot.lane.b32.xlu1 %v21_v0, %s181_s18  ;;  %26 = vrot.lane.b32.xlu0 %v21_v0, %s182_s19  ;;  %s183_s0 = smov [#allocation5]  }
  0x14   :  { %v24_v3 = vand.u32 127, %v23_v2  ;;  %s110_s20 = sshll.u32 %s183_s0, 4  ;;  %s111_s20 = int_to_ptr.vmem [resolvable:$true] %s110_s20 }
  0x15   :  { %s154_s23 = scalar_lea.vmem %s111_s20, 256  ;;  %p159_p9 = scmp.lt.s32.totalorder %s111_s20, %s111_s20 }
  0x16   :  { %v25_v4 = vadd.s32 128, %v24_v3  ;;  %v39_v7 = vand.u32 15, %v24_v3  ;;  %vm67_vm0 = vcmp.lt.s32.totalorder %v24_v3, 16  ;;  %vm30_vm1 = vcmp.lt.s32.totalorder %v24_v3, 1  ;;  %p155_p8 = scmp.ne.s32.totalorder %s111_s20, %s154_s23  ;;  %p160_p10 = scmp.lt.s32.totalorder %s154_s23, %s154_s23 }
  0x17   :  { %65 = vrot.lane.b32.xlu1 %v22_v1, %s181_s18  ;;  %28 = vrot.lane.b32.xlu0 %v22_v1, %s182_s19  ;;  %vm72_vm2 = vcmp.ge.s32.totalorder %v24_v3, 16 }
  0x18   :  { %v46_v8 = vand.u32 15, %v25_v4  ;;  %vm59_vm3 = vcmp.ne.s32.totalorder %v39_v7, 0  ;;  %p161_p11 = por %p160_p10, %p159_p9 }
  0x1a   :  { %vm60_vm4 = vcmp.ne.s32.totalorder %v46_v8, 0  ;;  %p162_p12 = pnand %p161_p11, %p155_p8 }
  0x85   :  { %v64_v5 = vpop.permute.xlu1 %63  ;;  %v27_v6 = vpop.permute.xlu0 %26 }
  0x89   :  { %v66_v9 = vpop.permute.xlu1 %65  ;;  %v29_v10 = vpop.permute.xlu0 %28 }
  0x8a   :  { %v68_v11 = vsel %vm67_vm0, %v64_v5, %v66_v9  ;;  %v69_v12 = vsel %vm67_vm0, %v66_v9, %v64_v5  ;;  %v31_v13 = vsel %vm30_vm1, %v27_v6, %v29_v10  ;;  %v32_v14 = vsel %vm30_vm1, %v29_v10, %v27_v6 }
  0x8b   :  { %v70_v15 = vsub.f32 %v21_v0, %v69_v12  ;;  %v71_v16 = vsub.f32 %v22_v1, %v68_v11  ;;  %v33_v17 = vsub.f32 %v21_v0, %v32_v14  ;;  %v34_v18 = vsub.f32 %v22_v1, %v31_v13 }
  0x8d   :  { %v77_v19 = vmul.f32 %v71_v16, %v71_v16  ;;  %v74_v20 = vsel %vm72_vm2, %v70_v15, 0.0  ;;  %v61_v21 = vsel %vm59_vm3, %v33_v17, 0.0  ;;  %v62_v22 = vsel %vm60_vm4, %v34_v18, 0.0 }
  0x8e   :  { %v76_v23 = vmul.f32 %v74_v20, %v74_v20  ;;  %v88_v24 = vmul.f32 %v61_v21, %v61_v21  ;;  %v89_v25 = vmul.f32 %v62_v22, %v62_v22 }
  0x90   :  { %v78_v26 = vadd.f32 %v77_v19, %v76_v23  ;;  %v90_v27 = vadd.f32 %v89_v25, %v88_v24 }
  0x92   :  { %79 = vadd.xlane.f32.xlu0 %v78_v26  ;;  %91 = vadd.xlane.f32.xlu1 %v90_v27 }
 0x11f   :  { %v92_v28 = vpop.xlane.xlu1 %91  ;;  %v80_v29 = vpop.xlane.xlu0 %79 }
 0x120   :  { %v93_v30 = vrot.slane %v92_v28, 4  ;;  %v81_v31 = vrot.slane %v80_v29, 4 }
 0x122   :  { %v94_v32 = vadd.f32 %v93_v30, %v92_v28  ;;  %v82_v33 = vadd.f32 %v81_v31, %v80_v29 }
 0x124   :  { %v95_v34 = vrot.slane %v94_v32, 2  ;;  %v83_v35 = vrot.slane %v82_v33, 2 }
 0x126   :  { %v96_v36 = vadd.f32 %v95_v34, %v94_v32  ;;  %v84_v37 = vadd.f32 %v83_v35, %v82_v33 }
 0x128   :  { %v85_v38 = vrot.slane %v84_v37, 1  ;;  %v97_v39 = vrot.slane %v96_v36, 1 }
 0x12a   :  { %v86_v40 = vadd.f32 %v85_v38, %v84_v37  ;;  %v98_v41 = vadd.f32 %v97_v39, %v96_v36 }
 0x12c   :  { %122 = vpush %v86_v40 }
 0x12d   :  { %124 = vpush %v98_v41 }
 0x15d   :  { %s123_s21 = spop %122 }
 0x15e   :  { %v100_v42 = vstv %s123_s21  ;;  %s125_s22 = spop %124 }
 0x15f   :  { %101 = vst [vmem:[#allocation5] sm:$0xff] %v100_v42  ;;  %v102_v43 = vstv %s125_s22 }
 0x160   :  { %104 = vst [vmem:[#allocation5 + $0x8] sm:$0xff] %v102_v43 }
 0x161   :  { %165 = shalt.err (!%p162_p12)
}
 0x162   :  { %s166_s26 = scalar_lea.hbm %s221_s1, 256 }
 0x163   :  { %p167_p13 = scmp.ne.s32.totalorder %s221_s1, %s166_s26  ;;  %p170_p0 = scmp.lt.u32.totalorder %s166_s26, %s221_s1 }
 0x165   :  { %p172_p1 = pnand %p170_p0, %p167_p13 }
 0x167   :  { %175 = shalt.err (!%p172_p1)
}
 0x168   :  { %s184_s2 = smov 128   ;;  %s185_s3 = smov 8  }
 0x169   :  { %116 = dma.vmem_to_hbm [thread:$0]  %s111_s20, 256, %s221_s1, [#allocation4], %s184_s2, %s184_s2, %s185_s3  }
 0x16a   :  { %178 = dma.done.wait [#allocation4], 256  }
 0x16b   :  { %179 = vsyncadd [#allocation4], 4294967040 }
 0x16c   :  { %120 = vsyncpa [#allocation3], 1 }
 0x16d   :  { %121 = vsyncpa [#allocation4], 1 }

</bundles_post_ra>
